<compile_context>
chip_gen: v5e
topology: v5e:2x2
jax: 0.10.0
libtpu: 0.0.40
codegen_flags: <defaults>
</compile_context>

<pallas_src>
import functools

import jax
import jax.numpy as jnp
from jax.experimental import pallas as pl
from jax.experimental.pallas import tpu as pltpu


_LANE = 128
_SUBLANE = 8
_VMEM_BUDGET = 48 * 1024 * 1024  # conservative: fits v7x 64 MiB physical VMEM


def _round_up(v, m):
    return ((v + m - 1) // m) * m


def densnet_kernel(x_ref, w1_ref, b1_ref, w2_ref, b2_ref, o_ref, *,
                   compute_dtype):
    # x_ref / o_ref: (C, TL) tile — channels on sublanes, positions on lanes.
    x = x_ref[...]

    h = jnp.maximum(x, 0.0).astype(compute_dtype)               # ReLU
    h = jnp.dot(w1_ref[...], h,                                 # conv1 (1x1)
                preferred_element_type=jnp.float32) + b1_ref[...]
    h = jnp.maximum(h, 0.0).astype(compute_dtype)               # ReLU
    h = jnp.dot(w2_ref[...], h,                                 # conv2 (1x1)
                preferred_element_type=jnp.float32) + b2_ref[...]

    # softmax over the channel (sublane) axis == dim=1 of NCL
    m = jnp.max(h, axis=0, keepdims=True)
    e = jnp.exp(h - m)
    s = jnp.sum(e, axis=0, keepdims=True)
    r = pl.reciprocal(s, approx=True)         # EUP slot instead of a VPU divide
    r = r * (2.0 - s * r)                      # one Newton step -> ~f32 accuracy
    o_ref[...] = (e * r).astype(o_ref.dtype)


def _choose_tile_len(L, C, x_itemsize, w_itemsize, target_len, budget):
    """Largest multiple-of-128 L-tile whose double-buffered in/out tiles plus
    in-kernel f32 intermediates fit the VMEM budget alongside the (double
    buffered, lane/sublane-padded) weights and biases."""
    c_sub = _round_up(C, _SUBLANE)
    c_lanes = _round_up(C, _LANE)
    fixed = 2 * 2 * c_sub * c_lanes * w_itemsize      # two weights, 2 buffers each
    fixed += 2 * 2 * c_sub * _LANE * 4                # two biases (lane-padded)

    def tile_cost(tl):
        io = 2 * 2 * c_sub * tl * x_itemsize          # in + out, double-buffered
        interm = 3 * c_sub * tl * 4                   # f32 intermediates (h, e, ...)
        return io + interm

    avail = max(budget - fixed - (4 << 20), tile_cost(_LANE))
    tl = min(_round_up(target_len, _LANE), _round_up(L, _LANE))
    while tl > _LANE and tile_cost(tl) > avail:
        tl -= _LANE
    return tl, fixed, tile_cost


def densnet_forward(x, w1, b1, w2, b2, *, target_tile_len=2048):
    """x: (N, C, L).  w1, w2: (C_out, C_in) conv weights (kernel dim squeezed).
    b1, b2: (C,) biases.  Returns softmax(conv2(relu(conv1(relu(x))))) over C,
    shape (N, C, L)."""
    N, C, L = x.shape
    x_itemsize = jnp.dtype(x.dtype).itemsize

    # bf16 MXU operands only pay off once C is large; keep f32 for tiny C.
    compute_dtype = jnp.bfloat16 if C >= 128 else jnp.float32
    w_itemsize = jnp.dtype(compute_dtype).itemsize

    TL, fixed_bytes, tile_cost = _choose_tile_len(
        L, C, x_itemsize, w_itemsize, target_tile_len, _VMEM_BUDGET)

    # If the grid would be a single step, halve the L tile (when possible) so
    # v7x megacore can split the work across both TensorCores.
    if N == 1 and _round_up(L, TL) == TL and TL >= 2 * _LANE:
        TL = _round_up(TL // 2, _LANE)

    padded_L = _round_up(L, TL)
    x_in = x if padded_L == L else jnp.pad(
        x, ((0, 0), (0, 0), (0, padded_L - L)))

    # y[co, t] = sum_ci W[co, ci] * h[ci, t]  ->  W @ h, no transpose needed.
    w1k = w1.astype(compute_dtype)
    w2k = w2.astype(compute_dtype)
    b1k = b1.reshape(C, 1).astype(jnp.float32)
    b2k = b2.reshape(C, 1).astype(jnp.float32)

    grid = (N, padded_L // TL)
    vmem_limit = _round_up(fixed_bytes + tile_cost(TL) + (4 << 20), 1 << 20)

    kernel = functools.partial(densnet_kernel, compute_dtype=compute_dtype)

    out = pl.pallas_call(
        kernel,
        out_shape=jax.ShapeDtypeStruct((N, C, padded_L), x.dtype),
        grid_spec=pltpu.PrefetchScalarGridSpec(
            num_scalar_prefetch=0,
            grid=grid,
            in_specs=[
                pl.BlockSpec((None, C, TL), lambda n, l: (n, 0, l)),  # x tile
                pl.BlockSpec((C, C), lambda n, l: (0, 0)),            # W1
                pl.BlockSpec((C, 1), lambda n, l: (0, 0)),            # b1
                pl.BlockSpec((C, C), lambda n, l: (0, 0)),            # W2
                pl.BlockSpec((C, 1), lambda n, l: (0, 0)),            # b2
            ],
            out_specs=pl.BlockSpec((None, C, TL), lambda n, l: (n, 0, l)),
        ),
        compiler_params=pltpu.CompilerParams(
            dimension_semantics=("parallel", "parallel"),
            vmem_limit_bytes=vmem_limit,
        ),
    )(x_in, w1k, b1k, w2k, b2k)

    return out if padded_L == L else out[:, :, :L]


def reference_forward(x, w1, b1, w2, b2):
    """Pure-JAX reference of the PyTorch module for sanity checking."""
    h = jnp.maximum(x, 0.0)
    h = jnp.einsum('oc,ncl->nol', w1, h) + b1[None, :, None]
    h = jnp.maximum(h, 0.0)
    h = jnp.einsum('oc,ncl->nol', w2, h) + b2[None, :, None]
    return jax.nn.softmax(h, axis=1)


if __name__ == "__main__":
    key = jax.random.PRNGKey(0)
    N, C, L = 2, 8, 16   # batch, channels, sequence length

    kx, k1w, k1b, k2w, k2b = jax.random.split(key, 5)
    x = jax.random.normal(kx, (N, C, L), dtype=jnp.float32)

    # Deterministic Conv1d-style init (uniform in +-1/sqrt(fan_in)), kernel
    # size 1 so weight is (C_out, C_in).
    bound = 1.0 / (C ** 0.5)
    w1 = jax.random.uniform(k1w, (C, C), jnp.float32, -bound, bound)
    b1 = jax.random.uniform(k1b, (C,), jnp.float32, -bound, bound)
    w2 = jax.random.uniform(k2w, (C, C), jnp.float32, -bound, bound)
    b2 = jax.random.uniform(k2b, (C,), jnp.float32, -bound, bound)

    out = densnet_forward(x, w1, b1, w2, b2)
    out = jax.block_until_ready(out)

    ref = reference_forward(x, w1, b1, w2, b2)
    assert out.shape == (N, C, L)
    assert jnp.allclose(out, ref, atol=1e-4, rtol=1e-4), "mismatch vs reference"

    print("KERNEL_OK")
</pallas_src>

<mosaic_0001>
module attributes {stable_mosaic.version = 11 : i64} {
  func.func @densnet_kernel(%arg0: i32, %arg1: i32, %arg2: memref<1x8x128xf32, #tpu.memory_space<vmem>>, %arg3: memref<8x8xf32, #tpu.memory_space<vmem>>, %arg4: memref<8x1xf32, #tpu.memory_space<vmem>>, %arg5: memref<8x8xf32, #tpu.memory_space<vmem>>, %arg6: memref<8x1xf32, #tpu.memory_space<vmem>>, %arg7: memref<1x8x128xf32, #tpu.memory_space<vmem>>) attributes {dimension_semantics = [#tpu.dimension_semantics<parallel>, #tpu.dimension_semantics<parallel>], iteration_bounds = array<i64: 2, 1>, scalar_prefetch = 0 : i64, scratch_operands = 0 : i64, tpu.core_type = #tpu.core_type<tc>, window_params = [{transform_indices = @transform_0, window_bounds = array<i64: 1, 8, 128>}, {pipeline_mode = #tpu.pipeline_mode<synchronous>, transform_indices = @transform_1, window_bounds = array<i64: 8, 8>}, {pipeline_mode = #tpu.pipeline_mode<synchronous>, transform_indices = @transform_2, window_bounds = array<i64: 8, 1>}, {pipeline_mode = #tpu.pipeline_mode<synchronous>, transform_indices = @transform_3, window_bounds = array<i64: 8, 8>}, {pipeline_mode = #tpu.pipeline_mode<synchronous>, transform_indices = @transform_4, window_bounds = array<i64: 8, 1>}, {transform_indices = @transform_5, window_bounds = array<i64: 1, 8, 128>}]} {
    %c0 = arith.constant 0 : index
    %c0_0 = arith.constant 0 : index
    %c0_1 = arith.constant 0 : index
    %0 = vector.load %arg2[%c0, %c0_0, %c0_1] : memref<1x8x128xf32, #tpu.memory_space<vmem>>, vector<1x8x128xf32>
    %1 = vector.shape_cast %0 : vector<1x8x128xf32> to vector<8x128xf32>
    %cst = arith.constant 0.000000e+00 : f32
    %2 = vector.broadcast %cst : f32 to vector<8x128xf32>
    %3 = arith.maximumf %1, %2 : vector<8x128xf32>
    %c0_2 = arith.constant 0 : index
    %c0_3 = arith.constant 0 : index
    %4 = vector.load %arg3[%c0_2, %c0_3] : memref<8x8xf32, #tpu.memory_space<vmem>>, vector<8x8xf32>
    %cst_4 = arith.constant dense<0.000000e+00> : vector<8x128xf32>
    %5 = tpu.matmul %4, %3, %cst_4 {dimension_numbers = #tpu.dot_dimension_numbers<[1], [0], [0], [1], [0, 0, 1, 1], [], []>} : vector<8x8xf32>, vector<8x128xf32>, vector<8x128xf32> -> vector<8x128xf32>
    %c0_5 = arith.constant 0 : index
    %c0_6 = arith.constant 0 : index
    %6 = vector.load %arg4[%c0_5, %c0_6] : memref<8x1xf32, #tpu.memory_space<vmem>>, vector<8x1xf32>
    %7 = vector.broadcast %6 : vector<8x1xf32> to vector<8x128xf32>
    %8 = arith.addf %5, %7 : vector<8x128xf32>
    %cst_7 = arith.constant 0.000000e+00 : f32
    %9 = vector.broadcast %cst_7 : f32 to vector<8x128xf32>
    %10 = arith.maximumf %8, %9 : vector<8x128xf32>
    %c0_8 = arith.constant 0 : index
    %c0_9 = arith.constant 0 : index
    %11 = vector.load %arg5[%c0_8, %c0_9] : memref<8x8xf32, #tpu.memory_space<vmem>>, vector<8x8xf32>
    %cst_10 = arith.constant dense<0.000000e+00> : vector<8x128xf32>
    %12 = tpu.matmul %11, %10, %cst_10 {dimension_numbers = #tpu.dot_dimension_numbers<[1], [0], [0], [1], [0, 0, 1, 1], [], []>} : vector<8x8xf32>, vector<8x128xf32>, vector<8x128xf32> -> vector<8x128xf32>
    %c0_11 = arith.constant 0 : index
    %c0_12 = arith.constant 0 : index
    %13 = vector.load %arg6[%c0_11, %c0_12] : memref<8x1xf32, #tpu.memory_space<vmem>>, vector<8x1xf32>
    %14 = vector.broadcast %13 : vector<8x1xf32> to vector<8x128xf32>
    %15 = arith.addf %12, %14 : vector<8x128xf32>
    %cst_13 = arith.constant dense<0xFF800000> : vector<128xf32>
    %16 = vector.multi_reduction <maximumf>, %15, %cst_13 [0] : vector<8x128xf32> to vector<128xf32>
    %17 = vector.shape_cast %16 : vector<128xf32> to vector<1x128xf32>
    %18 = vector.broadcast %17 : vector<1x128xf32> to vector<8x128xf32>
    %19 = arith.subf %15, %18 : vector<8x128xf32>
    %20 = math.exp %19 : vector<8x128xf32>
    %cst_14 = arith.constant dense<0.000000e+00> : vector<128xf32>
    %21 = vector.multi_reduction <add>, %20, %cst_14 [0] : vector<8x128xf32> to vector<128xf32>
    %22 = vector.shape_cast %21 : vector<128xf32> to vector<1x128xf32>
    %23 = tpu.reciprocal %22 {approx = true} : vector<1x128xf32> -> vector<1x128xf32>
    %24 = arith.mulf %22, %23 : vector<1x128xf32>
    %cst_15 = arith.constant 2.000000e+00 : f32
    %25 = vector.broadcast %cst_15 : f32 to vector<1x128xf32>
    %26 = arith.subf %25, %24 : vector<1x128xf32>
    %27 = arith.mulf %23, %26 : vector<1x128xf32>
    %28 = vector.broadcast %27 : vector<1x128xf32> to vector<8x128xf32>
    %29 = arith.mulf %20, %28 : vector<8x128xf32>
    %c0_16 = arith.constant 0 : index
    %c0_17 = arith.constant 0 : index
    %c0_18 = arith.constant 0 : index
    %30 = vector.load %arg7[%c0_16, %c0_17, %c0_18] : memref<1x8x128xf32, #tpu.memory_space<vmem>>, vector<1x8x128xf32>
    %31 = vector.shape_cast %30 : vector<1x8x128xf32> to vector<8x128xf32>
    %32 = vector.shape_cast %29 : vector<8x128xf32> to vector<1x8x128xf32>
    tpu.vector_store %arg7[%c0_16, %c0_17, %c0_18], %32 {strides = array<i32>} : memref<1x8x128xf32, #tpu.memory_space<vmem>>, vector<1x8x128xf32>,
    return
  }
  func.func @transform_0(%arg0: i32, %arg1: i32) -> (i32, i32, i32) {
    %c0_i32 = arith.constant 0 : i32
    %c0_i32_0 = arith.constant 0 : i32
    return %arg0, %c0_i32, %arg1 : i32, i32, i32
  }
  func.func @transform_1(%arg0: i32, %arg1: i32) -> (i32, i32) {
    %c0_i32 = arith.constant 0 : i32
    %c0_i32_0 = arith.constant 0 : i32
    %c0_i32_1 = arith.constant 0 : i32
    return %c0_i32, %c0_i32_0 : i32, i32
  }
  func.func @transform_2(%arg0: i32, %arg1: i32) -> (i32, i32) {
    %c0_i32 = arith.constant 0 : i32
    %c0_i32_0 = arith.constant 0 : i32
    %c0_i32_1 = arith.constant 0 : i32
    return %c0_i32, %c0_i32_0 : i32, i32
  }
  func.func @transform_3(%arg0: i32, %arg1: i32) -> (i32, i32) {
    %c0_i32 = arith.constant 0 : i32
    %c0_i32_0 = arith.constant 0 : i32
    %c0_i32_1 = arith.constant 0 : i32
    return %c0_i32, %c0_i32_0 : i32, i32
  }
  func.func @transform_4(%arg0: i32, %arg1: i32) -> (i32, i32) {
    %c0_i32 = arith.constant 0 : i32
    %c0_i32_0 = arith.constant 0 : i32
    %c0_i32_1 = arith.constant 0 : i32
    return %c0_i32, %c0_i32_0 : i32, i32
  }
  func.func @transform_5(%arg0: i32, %arg1: i32) -> (i32, i32, i32) {
    %c0_i32 = arith.constant 0 : i32
    %c0_i32_0 = arith.constant 0 : i32
    return %arg0, %c0_i32, %arg1 : i32, i32, i32
  }
}

</mosaic_0001>

<bundles_post_ra>
// kernel: tpu_custom_call.1
= control target key start
LH: loop header
LB: loop body
LE: loop exit
PB: predicated region body
PF: predicated region fallthrough
CT: control target
= control target key end

     0   :  { %10 = vsyncpa [#allocation3], 0  ;;  %s881_s0 = inlined_call_operand.vmem [shape: f32[2,8,128], index: 0, kind: input, shape index: {}]   ;;  %s882_s1 = inlined_call_operand.hbm [shape: f32[8,8], index: 1, kind: input, shape index: {}]   ;;  %s883_s2 = inlined_call_operand.vmem [shape: f32[8,1], index: 2, kind: input, shape index: {}]   ;;  %s884_s3 = inlined_call_operand.hbm [shape: f32[8,8], index: 3, kind: input, shape index: {}]   ;;  %s885_s4 = inlined_call_operand.vmem [shape: f32[8,1], index: 4, kind: input, shape index: {}]   ;;  %s886_s5 = inlined_call_operand.hbm [shape: f32[2,8,128], index: 5, kind: output, shape index: {}]  }
   0x1   :  { %11 = vsyncpa [#allocation6], 0 }
   0x2   :  { %12 = vsyncpa [#allocation4], 0 }
   0x3   :  { %14 = vsyncpa [#allocation4 + $0x1], 0  ;;  %s750_s18 = smov 0   ;;  %s752_s19 = smov 0  }
   0x4   :  { %s754_s20 = smov 0   ;;  %s756_s21 = smov 0  }
   0x5   :  { %s758_s22 = smov 0   ;;  %s760_s23 = smov 0  }
   0x6 LB: > { %s470_s24 = sadd.s32 4294967295, %s715_s23   ;;  %s471_s25 = sadd.s32 4294967294, %s715_s23   ;;  %s715_s23 = sphi %s760_s23, %s20_s23   ;;  %s711_s22 = sphi %s758_s22, %s895_s22   ;;  %s707_s21 = sphi %s756_s21, %s894_s21   ;;  %s703_s20 = sphi %s754_s20, %s893_s20   ;;  %s699_s19 = sphi %s752_s19, %s892_s19   ;;  %s695_s18 = sphi %s750_s18, %s891_s18  }
   0x7   : > { %s32_s26 = sadd.s32 1, %s711_s22  ;;  %s153_s27 = sadd.s32 1, %s703_s20 }
   0x8   : > { %p34_p0 = scmp.ge.s32.totalorder %s32_s26, 2  ;;  %p163_p1 = scmp.ne.s32.totalorder %s703_s20, %s699_s19 }
   0x9   : > { %p164_p2 = scmp.eq.s32.totalorder %s470_s24, 1  ;;  %p169_p3 = scmp.ne.s32.totalorder %s699_s19, %s695_s18 }
   0xa   : > { %s897_s26 = smov (%p34_p0, %s32_s26), 0  ;;  %p170_p5 = scmp.eq.s32.totalorder %s471_s25, 1 }
   0xb   : > { %p790_p4 = por %p164_p2, %p163_p1  ;;  %s148_s29 = ssub.s32 %s711_s22, %s897_s26 }
   0xc   : > { %p472_p6 = scmp.ge.s32.totalorder %s715_s23, 1  ;;  %p151_p7 = scmp.eq.s32.totalorder %s148_s29, 0 }
   0xd   : > { %p797_p8 = por %p170_p5, %p169_p3  ;;  %p177_p9 = scmp.lt.s32.totalorder %s715_s23, 3 }
   0xe   : > { %s803_s6 = scalar_select %p151_p7, %s703_s20, %s153_s27  }
   0xf   : > { %p805_p10 = pnand %p472_p6, %p177_p9  ;;  %p809_p11 = scmp.eq.s32.totalorder %s470_s24, 0 }
  0x10   : > { %s189_s11 = sshll.u32 %s882_s1, 4  ;;  %s717_s12 = smov [#allocation2]   ;;  %s190_s11 = int_to_ptr.hbm [resolvable:$true] %s189_s11 }
  0x11   : > { %p497_p12 = pneg %p805_p10  ;;  %s191_s13 = sshll.u32 %s717_s12, 4  ;;  %s192_s13 = int_to_ptr.vmem [resolvable:$true] %s191_s13 }
  0x12   : > { %s204_s16 = sshll.u32 %s884_s3, 4  ;;  %s718_s17 = smov [#allocation5]   ;;  %s205_s16 = int_to_ptr.hbm [resolvable:$true] %s204_s16 }
  0x13   : > { %p498_p13 = pnand %p809_p11, %p497_p12  ;;  %s206_s24 = sshll.u32 %s718_s17, 4  ;;  %s207_s24 = int_to_ptr.vmem [resolvable:$true] %s206_s24 }
  0x14   : > { %232 = sbr.rel (%p805_p10) target bundleno = 350 (0x15e), region = 40 }
  0x15   : > { %500 = dma.hbm_to_vmem [thread:$0]  (!%p498_p13), %s190_s11, 128, %s192_s13, [#allocation3]  }
  0x16   : > { %503 = dma.hbm_to_vmem [thread:$0]  (!%p498_p13), %s205_s16, 128, %s207_s24, [#allocation6]  }
  0x19   : > { %682 = dma.done.wait (%p809_p11), [#allocation3], 128  }
  0x1a   : > { %684 = vsyncadd (%p809_p11), [#allocation3], 4294967168 }
  0x1b   : > { %686 = dma.done.wait (%p809_p11), [#allocation6], 128  }
  0x1c   : > { %688 = vsyncadd (%p809_p11), [#allocation6], 4294967168  ;;  %p268_p0 = scmp.lt.s32.totalorder %s707_s21, 1  ;;  %v719_v0 = vmov 0   ;;  %v278_v2 = vld [vmem:[%s883_s2] sm:$0xff]  ;;  %vm284_vm0 = vcmask 64512  }
  0x1d   : > { %564 = vset.pattern.permute.xlu0 %v719_v0  ;;  %v277_v4 = vld [vmem:[#allocation2] sm:$0xff]  ;;  %v309_v10 = vld [vmem:[#allocation5] sm:$0xff]  ;;  %s265_s13 = sand.u32 1, %s699_s19   ;;  %s484_s15 = sshll.u32 %s707_s21, 3 }
  0x1e   : > { %s269_s25 = scalar_select %p268_p0, %s707_s21, 1  ;;  %281 = vperm.xlu0 %564, %v278_v2   ;;  %v310_v5 = vld [vmem:[%s885_s4] sm:$0xff] }
  0x1f   : > { %s479_s14 = sshll.u32 %s265_s13, 3  ;;  %s372_s24 = scalar_lea.hbm %s886_s5, %s484_s15 }
  0x20   : > { %s480_s27 = sshll.u32 %s269_s25, 3  ;;  %s267_s25 = scalar_lea.vmem [#allocation7], %s479_s14 }
  0x21   : > { %s274_s9 = scalar_lea.vmem %s881_s0, %s480_s27  ;;  %s374_s27 = sshll.u32 %s267_s25, 4  ;;  %s375_s27 = int_to_ptr.vmem [resolvable:$true] %s374_s27 }
  0x22   : > { %v275_v1 = vld [vmem:[%s274_s9] sm:$0xff]  ;;  %s376_s29 = sshll.u32 %s372_s24, 4  ;;  %s361_s7 = scalar_lea.sflag [#allocation4], %s265_s13  ;;  %s377_s29 = int_to_ptr.hbm [resolvable:$true] %s376_s29 }
  0x23   : > { %v276_v3 = vmax.f32 %v275_v1, 0.0  ;;  %s643_s9 = sshra.s32 %s377_s29, 4  ;;  %s649_s8 = scalar_lea.hbm %s886_s5, 16  ;;  %s644_s9 = int_to_ptr.hbm [resolvable:$true] %s643_s9 }
  0x24   : > { %s645_s21 = scalar_lea.hbm %s644_s9, 8  ;;  %p650_p5 = scmp.lt.s32.totalorder %s644_s9, %s886_s5 }
  0x25   : > { %303 = vmatpush.msra.mxu0 %v276_v3  ;;  %p646_p1 = scmp.ne.s32.totalorder %s644_s9, %s645_s21  ;;  %p651_p6 = scmp.lt.s32.totalorder %s649_s8, %s645_s21 }
  0x26   : > { %481 = vmatmul.msk.f32.vlgmr.msra.gmra.mxu0 %vm284_vm0, %v277_v4  ;;  %313 = vperm.xlu0 %564, %v310_v5  }
  0x27   : > { %p647_p2 = pnand %p646_p1, %p790_p4  ;;  %p652_p7 = por %p651_p6, %p650_p5 }
  0x29   : > { %p648_p3 = pneg %p647_p2 }
  0x2b   : > { %p653_p9 = pnand %p652_p7, %p648_p3 }
  0x90   : > { %v282_v6 = vpop.permute.xlu0 %281 }
  0x98   : > { %v314_v11 = vpop.permute.xlu0 %313 }
  0xa3   : > { %v305_v7 = vpop.f32.mrf.mxu0 }
  0xa4   : > { %v306_v8 = vadd.f32 %v305_v7, %v282_v6 }
  0xa6   : > { %v308_v9 = vmax.f32 %v306_v8, 0.0 }
  0xa8   : > { %334 = vmatpush.msra.mxu1 %v308_v9 }
  0xa9   : > { %482 = vmatmul.msk.f32.vlgmr.msra.gmra.mxu1 %vm284_vm0, %v309_v10 }
 0x126   : > { %v336_v12 = vpop.f32.mrf.mxu1 }
 0x127   : > { %v337_v13 = vadd.f32 %v336_v12, %v314_v11 }
 0x129   : > { %v339_v14 = vrot.slane %v337_v13, 4 }
 0x12b   : > { %v340_v15 = vmax.f32 %v337_v13, %v339_v14 }
 0x12d   : > { %v341_v16 = vrot.slane %v340_v15, 2 }
 0x12f   : > { %v342_v17 = vmax.f32 %v340_v15, %v341_v16 }
 0x131   : > { %v343_v18 = vrot.slane %v342_v17, 1 }
 0x133   : > { %v344_v19 = vmax.f32 %v342_v17, %v343_v18 }
 0x135   : > { %v345_v20 = vsub.f32 %v337_v13, %v344_v19 }
 0x137   : > { %v346_v21 = vmul.f32 1.442695, %v345_v20 }
 0x139   : > { %565 = vpow2.f32 %v346_v21 }
 0x13f   : > { %v566_v22 = vpop.eup %565 }
 0x140   : > { %v348_v23 = vrot.slane %v566_v22, 4 }
 0x142   : > { %v349_v24 = vadd.f32 %v566_v22, %v348_v23 }
 0x144   : > { %v350_v25 = vrot.slane %v349_v24, 2 }
 0x146   : > { %v351_v26 = vadd.f32 %v350_v25, %v349_v24 }
 0x148   : > { %v352_v27 = vrot.slane %v351_v26, 1 }
 0x14a   : > { %v353_v28 = vadd.f32 %v352_v27, %v351_v26 }
 0x14c   : > { %567 = vrcp.f32 %v353_v28 }
 0x152   : > { %v568_v29 = vpop.eup %567 }
 0x153   : > { %v355_v30 = vmul.f32 %v568_v29, %v353_v28 }
 0x155   : > { %v356_v31 = vsub.f32 2.0, %v355_v30 }
 0x157   : > { %v357_v32 = vmul.f32 %v568_v29, %v356_v31 }
 0x159   : > { %v358_v33 = vmul.f32 %v566_v22, %v357_v32 }
 0x15b   : > { %359 = vst [vmem:[%s267_s25] sm:$0xff] %v358_v33 }
 0x15c   : > { %656 = shalt.err (!%p653_p9)
}
 0x15d   : > { %495 = dma.vmem_to_hbm [thread:$0]  (%p790_p4), %s375_s27, 128, %s377_s29, %s361_s7  }
 0x15e PF: > { %p512_p10 = scmp.ge.s32.totalorder %s715_s23, 2  ;;  %s388_s13 = sand.u32 1, %s695_s18  }
 0x15f   : > { %s389_s15 = scalar_lea.sflag [#allocation4], %s388_s13 }
 0x160   : > { %p505_p11 = pnand %p512_p10, %p797_p8 }
 0x162   : > { %p506_p12 = pneg %p505_p11 }
 0x164   : > { %690 = dma.done.wait (%p506_p12), %s389_s15, 128  }
 0x165   : > { %692 = vsyncadd (%p506_p12), %s389_s15, 4294967168  ;;  %s20_s23 = sadd.s32 1, %s715_s23   ;;  %s891_s18 = smov %s699_s19 }
 0x166   : > { %p17_p13 = scmp.ge.s32.totalorder %s20_s23, 4   ;;  %s892_s19 = smov %s703_s20 }
 0x167   : > { %s893_s20 = smov %s803_s6  ;;  %s894_s21 = smov %s711_s22 }
 0x168   : > { %s895_s22 = smov %s897_s26  ;;  %19 = sbr.rel (!%p17_p13) target bundleno = 6 (0x6), region = 84 }
 0x16d   :  { %395 = vsyncpa [#allocation3], 1 }
 0x16e   :  { %397 = vsyncpa [#allocation3 + $0x1], 1 }
 0x16f   :  { %398 = vsyncpa [#allocation6], 1 }
 0x170   :  { %399 = vsyncpa [#allocation4], 1 }
 0x171   :  { %401 = vsyncpa [#allocation4 + $0x1], 1 }

</bundles_post_ra>
